<compile_context>
chip_gen: v7x
topology: tpu7x:2x2x1
jax: 0.10.0
libtpu: 0.0.40
codegen_flags: <defaults>
</compile_context>

<pallas_src>
import math

import jax
import jax.numpy as jnp
from jax.experimental import pallas as pl
from jax.experimental.pallas import tpu as pltpu

# ---- model hyperparameters (from the PyTorch module) ----
EMBEDDING_DIM = 32
MAX_LENGTH = 20
NUM_LAYERS = 2
POS_EMBEDDING_DIM = 2
VOCAB_SIZE = 50
VOCAB_PAD = 128          # lane-dense padded vocab width (multiple of 128)


def _fused_forward_kernel(tok_ref, pos_ref, wp_ref, bp_ref, wo_ref, bo_ref, out_ref):
    """Single-invocation fused forward (no grid).

    tok_ref : (B*S, E)   token embeddings, batch-major rows                  [VMEM]
    pos_ref : (S, P)     base positional embeddings                          [VMEM]
    wp_ref  : (L, P*P)   per-layer Linear(P,P) weights, PyTorch (out, in)
                         layout flattened row-major                          [SMEM]
    bp_ref  : (L, P)     per-layer Linear(P,P) biases                        [SMEM]
    wo_ref  : (E, VPAD)  output projection weight, transposed + zero-padded  [VMEM]
    bo_ref  : (1, VPAD)  output projection bias, zero-padded                 [VMEM]
    out_ref : (B*S, VPAD) logits (padded lanes are zero)                     [VMEM]
    """
    S = pos_ref.shape[0]
    B = tok_ref.shape[0] // S

    # ---- batch-invariant part: computed exactly once per forward pass ----------
    # positional embeddings as two (S, 1) column vectors (P == 2)
    p0 = pos_ref[:, 0:1]
    p1 = pos_ref[:, 1:2]

    combined = None                      # product of the per-layer attention matrices
    for layer in range(NUM_LAYERS):      # static unroll (NUM_LAYERS == 2)
        # Linear(P->P) with P=2: scalar weights from SMEM, applied on the VPU
        # (a K=2 MXU contraction would waste an entire systolic pass).
        w00 = wp_ref[layer, 0]           # W[out=0, in=0]
        w01 = wp_ref[layer, 1]           # W[out=0, in=1]
        w10 = wp_ref[layer, 2]           # W[out=1, in=0]
        w11 = wp_ref[layer, 3]           # W[out=1, in=1]
        b0 = bp_ref[layer, 0]
        b1 = bp_ref[layer, 1]
        a0 = p0 * w00 + p1 * w01 + b0    # pos_adjustments[:, 0]
        a1 = p0 * w10 + p1 * w11 + b1    # pos_adjustments[:, 1]
        p0 = p0 + a0                     # residual add
        p1 = p1 + a1

        # squared pairwise euclidean distances, direct diff form (exact, pure VPU)
        d0 = p0 - p0.T                   # (S, S)
        d1 = p1 - p1.T
        d2 = d0 * d0 + d1 * d1           # non-negative by construction

        # attention scores 1 / (d^2 + 1): EUP reciprocal instead of a VALU divide
        attn = pl.reciprocal(d2 + 1.0, approx=True)

        combined = attn if combined is None else jnp.dot(
            attn, combined, preferred_element_type=jnp.float32)

    # ---- per-batch part: one (S,S)x(S,E) matmul + lane-dense projection ---------
    wo = wo_ref[...]                     # (E, VPAD)
    bo = bo_ref[...]                     # (1, VPAD)
    # NOTE(v6e/v7x): for larger shapes cast `combined` / `tok_b` to bfloat16 here
    # (keeping preferred_element_type=jnp.float32 accumulation) to halve MXU-feed and
    # DMA bytes; kept in f32 at these tiny sizes to preserve reference precision.
    # Elementwise math above stays f32 (v5e VPU/EUP have no bf16).
    for b in range(B):                   # static unroll (B == 2)
        tok_b = tok_ref[pl.ds(b * S, S), :]                                   # (S, E)
        mixed = jnp.dot(combined, tok_b, preferred_element_type=jnp.float32)  # (S, E)
        out_ref[pl.ds(b * S, S), :] = (
            jnp.dot(mixed, wo, preferred_element_type=jnp.float32) + bo)      # (S, VPAD)


def custom_attention_forward(x, params):
    """x: (B, S) int32 token ids. Returns (B, S, VOCAB_SIZE) float32 logits."""
    B, S = x.shape
    E, P, V, L = EMBEDDING_DIM, POS_EMBEDDING_DIM, VOCAB_SIZE, NUM_LAYERS

    # --- glue: embedding lookup + parameter packing (plain JAX) ---
    tok2d = params["token_embedding"][x].astype(jnp.float32).reshape(B * S, E)
    pos_base = params["base_pos_embeddings"][:S, :].astype(jnp.float32)

    # Per-layer Linear(P,P) params, PyTorch (out, in) layout flattened row-major so
    # they can live in SMEM and be read as scalars inside the kernel.
    wp = jnp.stack([w.reshape(P * P) for w in params["pos_w"]], axis=0)   # (L, P*P)
    bp = jnp.stack(params["pos_b"], axis=0)                               # (L, P)

    # Output projection: transpose to (in, out) and zero-pad V=50 -> 128 so the
    # kernel's output stores are full-lane (unmasked) vreg stores.
    wo = jnp.zeros((E, VOCAB_PAD), jnp.float32).at[:, :V].set(params["out_w"].T)
    bo = jnp.zeros((1, VOCAB_PAD), jnp.float32).at[:, :V].set(params["out_b"][None, :])

    # Single gridless pallas_call: at S=8/E=32/V=50 the per-grid-step pipeline
    # overhead dwarfs the compute, so the whole batch is fused into one invocation.
    # If B grows large, re-introduce a coarse batch grid (a few batch elements per
    # step) with dimension_semantics=("parallel",) so v7x's two TensorCores split it.
    out2d = pl.pallas_call(
        _fused_forward_kernel,
        out_shape=jax.ShapeDtypeStruct((B * S, VOCAB_PAD), jnp.float32),
        in_specs=[
            pl.BlockSpec(memory_space=pltpu.MemorySpace.VMEM),   # tok2d (B*S, E)
            pl.BlockSpec(memory_space=pltpu.MemorySpace.VMEM),   # pos_base (S, P)
            pl.BlockSpec(memory_space=pltpu.MemorySpace.SMEM),   # wp (L, P*P) scalars
            pl.BlockSpec(memory_space=pltpu.MemorySpace.SMEM),   # bp (L, P) scalars
            pl.BlockSpec(memory_space=pltpu.MemorySpace.VMEM),   # wo (E, 128)
            pl.BlockSpec(memory_space=pltpu.MemorySpace.VMEM),   # bo (1, 128)
        ],
        out_specs=pl.BlockSpec(memory_space=pltpu.MemorySpace.VMEM),
    )(tok2d, pos_base, wp, bp, wo, bo)

    # back to (B, S, V): drop the zero padding lanes
    return out2d.reshape(B, S, VOCAB_PAD)[:, :, :V]


def init_params(key):
    """Deterministic parameter init mirroring the PyTorch module's shapes."""
    E, P, V, L, M = EMBEDDING_DIM, POS_EMBEDDING_DIM, VOCAB_SIZE, NUM_LAYERS, MAX_LENGTH
    keys = jax.random.split(key, 2 + 2 * L)

    # nn.Embedding(vocab_size, embedding_dim): N(0, 1)
    token_embedding = jax.random.normal(keys[0], (V, E), jnp.float32)

    # base positional embeddings: sin/cos ramp (non-trainable buffer)
    positions = jnp.arange(0.0, M, dtype=jnp.float32)[:, None]        # (M, 1)
    sin_pos = jnp.sin(0.5 * math.pi * positions / M)
    cos_pos = jnp.cos(0.5 * math.pi * positions / M)
    base_pos_embeddings = jnp.concatenate([sin_pos, cos_pos], axis=1)  # (M, 2)

    # nn.Linear(P, P) x L: U(-1/sqrt(P), 1/sqrt(P)); weights stored as (out, in)
    pos_w, pos_b = [], []
    bound_p = 1.0 / math.sqrt(P)
    for i in range(L):
        pos_w.append(jax.random.uniform(keys[1 + 2 * i], (P, P), jnp.float32,
                                        -bound_p, bound_p))
        pos_b.append(jax.random.uniform(keys[2 + 2 * i], (P,), jnp.float32,
                                        -bound_p, bound_p))

    # nn.Linear(E, V): U(-1/sqrt(E), 1/sqrt(E)); weight (out, in) = (V, E)
    bound_o = 1.0 / math.sqrt(E)
    kw, kb = jax.random.split(keys[-1])
    out_w = jax.random.uniform(kw, (V, E), jnp.float32, -bound_o, bound_o)
    out_b = jax.random.uniform(kb, (V,), jnp.float32, -bound_o, bound_o)

    return {
        "token_embedding": token_embedding,
        "base_pos_embeddings": base_pos_embeddings,
        "pos_w": pos_w,
        "pos_b": pos_b,
        "out_w": out_w,
        "out_b": out_b,
    }


def _reference_forward(x, params):
    """Pure-JAX reference replicating the PyTorch forward, for sanity checking."""
    tok = params["token_embedding"][x]                        # (B, S, E)
    S = x.shape[1]
    pos = jnp.broadcast_to(params["base_pos_embeddings"][:S, :],
                           (x.shape[0], S, POS_EMBEDDING_DIM))
    for layer in range(NUM_LAYERS):
        w, b = params["pos_w"][layer], params["pos_b"][layer]
        adj = pos @ w.T + b
        pos = pos + adj
        diff = pos[:, :, None, :] - pos[:, None, :, :]
        d2 = jnp.sum(diff * diff, axis=-1)                    # (B, S, S)
        attn = 1.0 / (d2 + 1.0)
        tok = jnp.einsum("bij,bjd->bid", attn, tok)
    return tok @ params["out_w"].T + params["out_b"]


if __name__ == "__main__":
    key = jax.random.PRNGKey(0)
    k_params, k_x = jax.random.split(key)

    params = init_params(k_params)

    # small example input: batch=2, sequence length=8 (<= max_length=20)
    B, S = 2, 8
    x = jax.random.randint(k_x, (B, S), 0, VOCAB_SIZE, dtype=jnp.int32)

    out = jax.block_until_ready(custom_attention_forward(x, params))
    ref = _reference_forward(x, params)

    assert out.shape == (B, S, VOCAB_SIZE), out.shape
    # Tolerance reflects the approximate EUP reciprocal used for the attention
    # scores (~1e-4-relative), propagated through two attention applications and
    # the output projection; exact-math structural bugs would be O(1) off.
    assert jnp.allclose(out, ref, atol=2e-2, rtol=2e-2), "mismatch vs reference"

    print("KERNEL_OK")
</pallas_src>

<mosaic_0001>
module attributes {stable_mosaic.version = 11 : i64} {
  func.func @_fused_forward_kernel(%arg0: memref<16x32xf32, #tpu.memory_space<vmem>>, %arg1: memref<8x2xf32, #tpu.memory_space<vmem>>, %arg2: memref<2x4xf32, #tpu.memory_space<smem>>, %arg3: memref<2x2xf32, #tpu.memory_space<smem>>, %arg4: memref<32x128xf32, #tpu.memory_space<vmem>>, %arg5: memref<1x128xf32, #tpu.memory_space<vmem>>, %arg6: memref<16x128xf32, #tpu.memory_space<vmem>>) attributes {dimension_semantics = [], scalar_prefetch = 0 : i64, scratch_operands = 0 : i64, tpu.core_type = #tpu.core_type<tc>} {
    %c0 = arith.constant 0 : index
    %c0_0 = arith.constant 0 : index
    %0 = vector.load %arg1[%c0, %c0_0] : memref<8x2xf32, #tpu.memory_space<vmem>>, vector<8x1xf32>
    %c0_1 = arith.constant 0 : index
    %c1 = arith.constant 1 : index
    %1 = vector.load %arg1[%c0_1, %c1] : memref<8x2xf32, #tpu.memory_space<vmem>>, vector<8x1xf32>
    %c0_2 = arith.constant 0 : index
    %c0_3 = arith.constant 0 : index
    %2 = memref.load %arg2[%c0_2, %c0_3] : memref<2x4xf32, #tpu.memory_space<smem>>
    %c0_4 = arith.constant 0 : index
    %c1_5 = arith.constant 1 : index
    %3 = memref.load %arg2[%c0_4, %c1_5] : memref<2x4xf32, #tpu.memory_space<smem>>
    %c0_6 = arith.constant 0 : index
    %c2 = arith.constant 2 : index
    %4 = memref.load %arg2[%c0_6, %c2] : memref<2x4xf32, #tpu.memory_space<smem>>
    %c0_7 = arith.constant 0 : index
    %c3 = arith.constant 3 : index
    %5 = memref.load %arg2[%c0_7, %c3] : memref<2x4xf32, #tpu.memory_space<smem>>
    %c0_8 = arith.constant 0 : index
    %c0_9 = arith.constant 0 : index
    %6 = memref.load %arg3[%c0_8, %c0_9] : memref<2x2xf32, #tpu.memory_space<smem>>
    %c0_10 = arith.constant 0 : index
    %c1_11 = arith.constant 1 : index
    %7 = memref.load %arg3[%c0_10, %c1_11] : memref<2x2xf32, #tpu.memory_space<smem>>
    %8 = vector.broadcast %2 : f32 to vector<8x1xf32>
    %9 = arith.mulf %0, %8 : vector<8x1xf32>
    %10 = vector.broadcast %3 : f32 to vector<8x1xf32>
    %11 = arith.mulf %1, %10 : vector<8x1xf32>
    %12 = arith.addf %9, %11 : vector<8x1xf32>
    %13 = vector.broadcast %6 : f32 to vector<8x1xf32>
    %14 = arith.addf %12, %13 : vector<8x1xf32>
    %15 = vector.broadcast %4 : f32 to vector<8x1xf32>
    %16 = arith.mulf %0, %15 : vector<8x1xf32>
    %17 = vector.broadcast %5 : f32 to vector<8x1xf32>
    %18 = arith.mulf %1, %17 : vector<8x1xf32>
    %19 = arith.addf %16, %18 : vector<8x1xf32>
    %20 = vector.broadcast %7 : f32 to vector<8x1xf32>
    %21 = arith.addf %19, %20 : vector<8x1xf32>
    %22 = arith.addf %0, %14 : vector<8x1xf32>
    %23 = arith.addf %1, %21 : vector<8x1xf32>
    %24 = tpu.transpose %22, [1, 0] : vector<8x1xf32> -> vector<1x8xf32>
    %25 = vector.broadcast %22 : vector<8x1xf32> to vector<8x8xf32>
    %26 = vector.broadcast %24 : vector<1x8xf32> to vector<8x8xf32>
    %27 = arith.subf %25, %26 : vector<8x8xf32>
    %28 = tpu.transpose %23, [1, 0] : vector<8x1xf32> -> vector<1x8xf32>
    %29 = vector.broadcast %23 : vector<8x1xf32> to vector<8x8xf32>
    %30 = vector.broadcast %28 : vector<1x8xf32> to vector<8x8xf32>
    %31 = arith.subf %29, %30 : vector<8x8xf32>
    %32 = arith.mulf %27, %27 : vector<8x8xf32>
    %33 = arith.mulf %31, %31 : vector<8x8xf32>
    %34 = arith.addf %32, %33 : vector<8x8xf32>
    %cst = arith.constant 1.000000e+00 : f32
    %35 = vector.broadcast %cst : f32 to vector<8x8xf32>
    %36 = arith.addf %34, %35 : vector<8x8xf32>
    %37 = tpu.reciprocal %36 {approx = true} : vector<8x8xf32> -> vector<8x8xf32>
    %c1_12 = arith.constant 1 : index
    %c0_13 = arith.constant 0 : index
    %38 = memref.load %arg2[%c1_12, %c0_13] : memref<2x4xf32, #tpu.memory_space<smem>>
    %c1_14 = arith.constant 1 : index
    %c1_15 = arith.constant 1 : index
    %39 = memref.load %arg2[%c1_14, %c1_15] : memref<2x4xf32, #tpu.memory_space<smem>>
    %c1_16 = arith.constant 1 : index
    %c2_17 = arith.constant 2 : index
    %40 = memref.load %arg2[%c1_16, %c2_17] : memref<2x4xf32, #tpu.memory_space<smem>>
    %c1_18 = arith.constant 1 : index
    %c3_19 = arith.constant 3 : index
    %41 = memref.load %arg2[%c1_18, %c3_19] : memref<2x4xf32, #tpu.memory_space<smem>>
    %c1_20 = arith.constant 1 : index
    %c0_21 = arith.constant 0 : index
    %42 = memref.load %arg3[%c1_20, %c0_21] : memref<2x2xf32, #tpu.memory_space<smem>>
    %c1_22 = arith.constant 1 : index
    %c1_23 = arith.constant 1 : index
    %43 = memref.load %arg3[%c1_22, %c1_23] : memref<2x2xf32, #tpu.memory_space<smem>>
    %44 = vector.broadcast %38 : f32 to vector<8x1xf32>
    %45 = arith.mulf %22, %44 : vector<8x1xf32>
    %46 = vector.broadcast %39 : f32 to vector<8x1xf32>
    %47 = arith.mulf %23, %46 : vector<8x1xf32>
    %48 = arith.addf %45, %47 : vector<8x1xf32>
    %49 = vector.broadcast %42 : f32 to vector<8x1xf32>
    %50 = arith.addf %48, %49 : vector<8x1xf32>
    %51 = vector.broadcast %40 : f32 to vector<8x1xf32>
    %52 = arith.mulf %22, %51 : vector<8x1xf32>
    %53 = vector.broadcast %41 : f32 to vector<8x1xf32>
    %54 = arith.mulf %23, %53 : vector<8x1xf32>
    %55 = arith.addf %52, %54 : vector<8x1xf32>
    %56 = vector.broadcast %43 : f32 to vector<8x1xf32>
    %57 = arith.addf %55, %56 : vector<8x1xf32>
    %58 = arith.addf %22, %50 : vector<8x1xf32>
    %59 = arith.addf %23, %57 : vector<8x1xf32>
    %60 = tpu.transpose %58, [1, 0] : vector<8x1xf32> -> vector<1x8xf32>
    %61 = vector.broadcast %58 : vector<8x1xf32> to vector<8x8xf32>
    %62 = vector.broadcast %60 : vector<1x8xf32> to vector<8x8xf32>
    %63 = arith.subf %61, %62 : vector<8x8xf32>
    %64 = tpu.transpose %59, [1, 0] : vector<8x1xf32> -> vector<1x8xf32>
    %65 = vector.broadcast %59 : vector<8x1xf32> to vector<8x8xf32>
    %66 = vector.broadcast %64 : vector<1x8xf32> to vector<8x8xf32>
    %67 = arith.subf %65, %66 : vector<8x8xf32>
    %68 = arith.mulf %63, %63 : vector<8x8xf32>
    %69 = arith.mulf %67, %67 : vector<8x8xf32>
    %70 = arith.addf %68, %69 : vector<8x8xf32>
    %cst_24 = arith.constant 1.000000e+00 : f32
    %71 = vector.broadcast %cst_24 : f32 to vector<8x8xf32>
    %72 = arith.addf %70, %71 : vector<8x8xf32>
    %73 = tpu.reciprocal %72 {approx = true} : vector<8x8xf32> -> vector<8x8xf32>
    %cst_25 = arith.constant dense<0.000000e+00> : vector<8x8xf32>
    %74 = tpu.matmul %73, %37, %cst_25 {dimension_numbers = #tpu.dot_dimension_numbers<[1], [0], [0], [1], [0, 0, 1, 1], [], []>} : vector<8x8xf32>, vector<8x8xf32>, vector<8x8xf32> -> vector<8x8xf32>
    %c0_26 = arith.constant 0 : index
    %c0_27 = arith.constant 0 : index
    %75 = vector.load %arg4[%c0_26, %c0_27] : memref<32x128xf32, #tpu.memory_space<vmem>>, vector<32x128xf32>
    %c0_28 = arith.constant 0 : index
    %c0_29 = arith.constant 0 : index
    %76 = vector.load %arg5[%c0_28, %c0_29] : memref<1x128xf32, #tpu.memory_space<vmem>>, vector<1x128xf32>
    %c0_30 = arith.constant 0 : index
    %c0_31 = arith.constant 0 : index
    %77 = vector.load %arg0[%c0_30, %c0_31] : memref<16x32xf32, #tpu.memory_space<vmem>>, vector<8x32xf32>
    %cst_32 = arith.constant dense<0.000000e+00> : vector<8x32xf32>
    %78 = tpu.matmul %74, %77, %cst_32 {dimension_numbers = #tpu.dot_dimension_numbers<[1], [0], [0], [1], [0, 0, 1, 1], [], []>} : vector<8x8xf32>, vector<8x32xf32>, vector<8x32xf32> -> vector<8x32xf32>
    %cst_33 = arith.constant dense<0.000000e+00> : vector<8x128xf32>
    %79 = tpu.matmul %78, %75, %cst_33 {dimension_numbers = #tpu.dot_dimension_numbers<[1], [0], [0], [1], [0, 0, 1, 1], [], []>} : vector<8x32xf32>, vector<32x128xf32>, vector<8x128xf32> -> vector<8x128xf32>
    %80 = vector.broadcast %76 : vector<1x128xf32> to vector<8x128xf32>
    %81 = arith.addf %79, %80 : vector<8x128xf32>
    %c0_34 = arith.constant 0 : index
    %c0_35 = arith.constant 0 : index
    %82 = vector.load %arg6[%c0_34, %c0_35] : memref<16x128xf32, #tpu.memory_space<vmem>>, vector<8x128xf32>
    tpu.vector_store %arg6[%c0_34, %c0_35], %81 {strides = array<i32>} : memref<16x128xf32, #tpu.memory_space<vmem>>, vector<8x128xf32>,
    %c8 = arith.constant 8 : index
    %c0_36 = arith.constant 0 : index
    %83 = vector.load %arg0[%c8, %c0_36] : memref<16x32xf32, #tpu.memory_space<vmem>>, vector<8x32xf32>
    %cst_37 = arith.constant dense<0.000000e+00> : vector<8x32xf32>
    %84 = tpu.matmul %74, %83, %cst_37 {dimension_numbers = #tpu.dot_dimension_numbers<[1], [0], [0], [1], [0, 0, 1, 1], [], []>} : vector<8x8xf32>, vector<8x32xf32>, vector<8x32xf32> -> vector<8x32xf32>
    %cst_38 = arith.constant dense<0.000000e+00> : vector<8x128xf32>
    %85 = tpu.matmul %84, %75, %cst_38 {dimension_numbers = #tpu.dot_dimension_numbers<[1], [0], [0], [1], [0, 0, 1, 1], [], []>} : vector<8x32xf32>, vector<32x128xf32>, vector<8x128xf32> -> vector<8x128xf32>
    %86 = vector.broadcast %76 : vector<1x128xf32> to vector<8x128xf32>
    %87 = arith.addf %85, %86 : vector<8x128xf32>
    %c8_39 = arith.constant 8 : index
    %c0_40 = arith.constant 0 : index
    %88 = vector.load %arg6[%c8_39, %c0_40] : memref<16x128xf32, #tpu.memory_space<vmem>>, vector<8x128xf32>
    tpu.vector_store %arg6[%c8_39, %c0_40], %87 {strides = array<i32>} : memref<16x128xf32, #tpu.memory_space<vmem>>, vector<8x128xf32>,
    return
  }
}

</mosaic_0001>

<bundles_post_ra>
// kernel: tpu_custom_call.1
= control target key start
LH: loop header
LB: loop body
LE: loop exit
PB: predicated region body
PF: predicated region fallthrough
CT: control target
= control target key end

     0   :  { %11 = vsyncpa [#allocation3], 0  ;;  %s1062_s0 = inlined_call_operand.hbm [shape: f32[16,32], index: 0, kind: input, shape index: {}]   ;;  %s1063_s1 = inlined_call_operand.vmem [shape: f32[8,2], index: 1, kind: input, shape index: {}]   ;;  %s1064_s2 = inlined_call_operand.vmem [shape: f32[2,4], index: 2, kind: input, shape index: {}]   ;;  %s1065_s3 = inlined_call_operand.vmem [shape: f32[2,2], index: 3, kind: input, shape index: {}]   ;;  %s1066_s4 = inlined_call_operand.hbm [shape: f32[32,128], index: 4, kind: input, shape index: {}]   ;;  %s1067_s5 = inlined_call_operand.vmem [shape: f32[1,128], index: 5, kind: input, shape index: {}]   ;;  %s1068_s6 = inlined_call_operand.hbm [shape: f32[16,128], index: 6, kind: output, shape index: {}]  }
   0x1   :  { %12 = vsyncpa [#allocation5], 0 }
   0x2   :  { %13 = vsyncpa [#allocation8], 0 }
   0x3   :  { %14 = vsyncpa [#allocation10], 0 }
   0x4   :  { %15 = vsyncpa [#allocation4], 0  ;;  %s932_s21 = smov [#allocation2]   ;;  %s36_s25 = sshll.u32 %s1064_s2, 4  ;;  %s37_s25 = int_to_ptr.vmem [resolvable:$true] %s36_s25 }
   0x5   :  { %s21_s22 = sshll.u32 %s932_s21, 4  ;;  %s832_s28 = scalar_lea.hbm %s1062_s0, 256  ;;  %s22_s22 = int_to_ptr.vmem [resolvable:$true] %s21_s22 }
   0x6   :  { %p833_p0 = scmp.ne.s32.totalorder %s1062_s0, %s832_s28  ;;  %p836_p1 = scmp.lt.u32.totalorder %s832_s28, %s1062_s0 }
   0x8   :  { %p838_p2 = pnand %p836_p1, %p833_p0 }
   0xa   :  { %841 = shalt.err (!%p838_p2)
}
   0xb   :  { %s842_s9 = scalar_lea.vmem %s22_s22, 256  ;;  %p847_p4 = scmp.lt.s32.totalorder %s22_s22, %s22_s22 }
   0xc   :  { %p843_p3 = scmp.ne.s32.totalorder %s22_s22, %s842_s9  ;;  %p848_p5 = scmp.lt.s32.totalorder %s842_s9, %s842_s9 }
   0xe   :  { %p849_p6 = por %p848_p5, %p847_p4 }
  0x10   :  { %p850_p7 = pnand %p849_p6, %p843_p3 }
  0x12   :  { %853 = shalt.err (!%p850_p7)
}
  0x13   :  { %s933_s2 = smov 128   ;;  %s934_s10 = smov 8  }
  0x14   :  { %27 = dma.hbm_to_vmem [thread:$0]  %s1062_s0, 256, %s22_s22, [#allocation3], %s933_s2, %s933_s2, %s934_s10  }
  0x15   :  { %s854_s13 = scalar_lea.vmem %s37_s25, 32  ;;  %p859_p9 = scmp.lt.s32.totalorder %s37_s25, %s37_s25 }
  0x16   :  { %p855_p8 = scmp.ne.s32.totalorder %s37_s25, %s854_s13  ;;  %p860_p10 = scmp.lt.s32.totalorder %s854_s13, %s854_s13 }
  0x18   :  { %p861_p11 = por %p860_p10, %p859_p9 }
  0x1a   :  { %p862_p12 = pnand %p861_p11, %p855_p8 }
  0x1c   :  { %865 = shalt.err (!%p862_p12)
}
  0x1d   :  { %s935_s14 = smov [#allocation6]   ;;  %s46_s17 = sshll.u32 %s1065_s3, 4  ;;  %s47_s17 = int_to_ptr.vmem [resolvable:$true] %s46_s17 }
  0x1e   :  { %39 = dma.vmem_to_smem %s37_s25, 32, %s935_s14, [#allocation5]  }
  0x1f   :  { %s866_s18 = scalar_lea.vmem %s47_s17, 32  ;;  %p871_p0 = scmp.lt.s32.totalorder %s47_s17, %s47_s17 }
  0x20   :  { %p867_p13 = scmp.ne.s32.totalorder %s47_s17, %s866_s18  ;;  %p872_p1 = scmp.lt.s32.totalorder %s866_s18, %s866_s18 }
  0x22   :  { %p873_p2 = por %p872_p1, %p871_p0 }
  0x24   :  { %p874_p3 = pnand %p873_p2, %p867_p13 }
  0x26   :  { %877 = shalt.err (!%p874_p3)
}
  0x27   :  { %s936_s0 = smov [#allocation7]   ;;  %s937_s19 = smov [#allocation9]  }
  0x28   :  { %49 = dma.vmem_to_smem %s47_s17, 32, %s936_s0, [#allocation8]  }
  0x29   :  { %s55_s20 = sshll.u32 %s937_s19, 4  ;;  %s878_s23 = scalar_lea.hbm %s1066_s4, 512  ;;  %s56_s20 = int_to_ptr.vmem [resolvable:$true] %s55_s20 }
  0x2a   :  { %p879_p4 = scmp.ne.s32.totalorder %s1066_s4, %s878_s23  ;;  %p882_p5 = scmp.lt.u32.totalorder %s878_s23, %s1066_s4 }
  0x2c   :  { %p884_p6 = pnand %p882_p5, %p879_p4 }
  0x2e   :  { %887 = shalt.err (!%p884_p6)
}
  0x2f   :  { %s888_s27 = scalar_lea.vmem %s56_s20, 512  ;;  %p893_p8 = scmp.lt.s32.totalorder %s56_s20, %s56_s20 }
  0x30   :  { %p889_p7 = scmp.ne.s32.totalorder %s56_s20, %s888_s27  ;;  %p894_p9 = scmp.lt.s32.totalorder %s888_s27, %s888_s27 }
  0x32   :  { %p895_p10 = por %p894_p9, %p893_p8 }
  0x34   :  { %p896_p11 = pnand %p895_p10, %p889_p7 }
  0x36   :  { %899 = shalt.err (!%p896_p11)
}
  0x37   :  { %61 = dma.hbm_to_vmem [thread:$0]  %s1066_s4, 512, %s56_s20, [#allocation10], %s933_s2, %s933_s2, %s934_s10  }
  0x38   :  { %922 = dma.done.wait [#allocation3], 256  }
  0x39   :  { %923 = vsyncadd [#allocation3], 4294967040 }
  0x3a   :  { %924 = dma.done.wait [#allocation5], 32  }
  0x3b   :  { %925 = vsyncadd [#allocation5], 4294967264 }
  0x3c   :  { %926 = dma.done.wait [#allocation8], 32  }
  0x3d   :  { %927 = vsyncadd [#allocation8], 4294967264 }
  0x3e   :  { %928 = dma.done.wait [#allocation10], 512  }
  0x3f   :  { %929 = vsyncadd [#allocation10], 4294966784 }
  0x40   :  { %76 = sfence }
  0x41   :  { %s731_s30 = sld [smem:[#allocation6 + $0x3]]  ;;  %s729_s7 = sld [smem:[#allocation6 + $0x1]]  ;;  %v77_v0 = vld [vmem:[%s1063_s1] sm:$0xff]  ;;  %v940_v26 = vmov 1   ;;  %v941_v41 = vmov 0   ;;  %v942_v42 = vmov 0.0   ;;  %v149_v45 = vlaneseq }
  0x42   :  { %s938_s11 = smov 127   ;;  %s730_s4 = sld [smem:[#allocation6 + $0x2]]  ;;  %824 = vset.pattern.permute.xlu1 %v940_v26  ;;  %761 = vmatprep.subr.mxu0 %v942_v42  ;;  %vm943_vm0 = vmmov 0   ;;  %v409_v44 = vld [vmem:[#allocation2] sm:$0xff]  ;;  %vm330_vm1 = vcmask 64512   ;;  %vm489_vm2 = vcmask 261120  }
  0x43   :  { %s732_s12 = sld [smem:[#allocation7 + $0x1]]  ;;  %s939_s13 = smov 1   ;;  %766 = vmatprep.subr.mxu1 %v942_v42  ;;  %763 = vmatprep.mubr.msk.f32.mxu0 %vm943_vm0, %v942_v42  ;;  %v150_v46 = vshrl.u32 %v149_v45, 7 }
  0x44   :  { %s736_s1 = sld [smem:[#allocation6 + $0x83]]  ;;  %s734_s14 = sld [smem:[#allocation6 + $0x81]]  ;;  %768 = vmatprep.mubr.msk.f32.mxu1 %vm943_vm0, %v942_v42  ;;  %767 = vmatpush3.msra.mxu1 %v409_v44 }
  0x45   :  { %s78_s15 = sld [smem:[#allocation6]]  ;;  %s735_s17 = sld [smem:[#allocation6 + $0x82]]  ;;  %782 = vmatprep.subr.mxu1 %v942_v42  ;;  %v151_v48 = vsub.s32 0, %v150_v46 }
  0x46   :  { %s82_s16 = sld [smem:[#allocation7]]  ;;  %s738_s18 = sld [smem:[#allocation7 + $0x81]] }
  0x47   :  { %v97_v1 = vstv %s731_s30  ;;  %v86_v3 = vstv %s729_s7  ;;  %s733_s0 = sld [smem:[#allocation6 + $0x80]]  ;;  %s945_s22 = smov [#allocation11]  }
  0x48   :  { %v98_v2 = vmul.f32 %v97_v1, %v77_v0  ;;  %v87_v4 = vmul.f32 %v86_v3, %v77_v0  ;;  %v95_v5 = vstv %s730_s4  ;;  %s737_s19 = sld [smem:[#allocation7 + $0x80]]  ;;  %s714_s23 = sshll.u32 %s945_s22, 4  ;;  %s715_s23 = int_to_ptr.vmem [resolvable:$true] %s714_s23 }
  0x49   :  { %v96_v6 = vmul.f32 %v95_v5, %v77_v0  ;;  %v104_v7 = vstv %s732_s12  ;;  %s900_s24 = scalar_lea.vmem %s715_s23, 256  ;;  %p905_p13 = scmp.lt.s32.totalorder %s715_s23, %s715_s23 }
  0x4a   :  { %100 = vrot.lane.b32.xlu0 %v98_v2, %s938_s11  ;;  %89 = vrot.lane.b32.xlu1 %v87_v4, %s938_s11  ;;  %v223_v12 = vstv %s736_s1  ;;  %v212_v15 = vstv %s734_s14  ;;  %p901_p12 = scmp.ne.s32.totalorder %s715_s23, %s900_s24  ;;  %p906_p0 = scmp.lt.s32.totalorder %s900_s24, %s900_s24 }
  0x4b   :  { %v84_v17 = vstv %s78_s15  ;;  %v221_v24 = vstv %s735_s17 }
  0x4c   :  { %v85_v18 = vmul.f32 %v84_v17, %v77_v0  ;;  %v93_v21 = vstv %s82_s16  ;;  %v230_v27 = vstv %s738_s18  ;;  %v564_v17 = vld [vmem:[#allocation2 + $0x8] sm:$0xff]  ;;  %p907_p1 = por %p906_p0, %p905_p13 }
  0x4d   :  { %v210_v31 = vstv %s733_s0 }
  0x4e   :  { %v219_v37 = vstv %s737_s19  ;;  %p908_p2 = pnand %p907_p1, %p901_p12 }
  0xbc   :  { %v101_v8 = vpop.permute.xlu0 %100  ;;  %v90_v19 = vpop.permute.xlu1 %89 }
  0xbd   :  { %v103_v9 = vadd.f32 %v101_v8, %v96_v6  ;;  %v92_v20 = vadd.f32 %v90_v19, %v85_v18 }
  0xbf   :  { %v105_v10 = vadd.f32 %v104_v7, %v103_v9  ;;  %v94_v22 = vadd.f32 %v93_v21, %v92_v20 }
  0xc1   :  { %108 = vrot.lane.b32.xlu0 %v105_v10, %s939_s13  ;;  %v106_v23 = vadd.f32 %v94_v22, %v77_v0  ;;  %v404_v10 = vld [vmem:[#allocation9] sm:$0xff] }
  0xc3   :  { %v222_v25 = vmul.f32 %v221_v24, %v106_v23  ;;  %v211_v33 = vmul.f32 %v210_v31, %v106_v23  ;;  %v741_v24 = vld [vmem:[%s1067_s5] ss:$0 sm:$0xff] }
 0x133   :  { %v109_v11 = vpop.permute.xlu0 %108 }
 0x134   :  { %v111_v13 = vadd.f32 %v109_v11, %v77_v0  ;;  %v405_v11 = vld [vmem:[#allocation9 + $0x8] sm:$0xff] }
 0x136   :  { %v224_v14 = vmul.f32 %v223_v12, %v111_v13  ;;  %v213_v16 = vmul.f32 %v212_v15, %v111_v13  ;;  %v406_v12 = vld [vmem:[#allocation9 + $0x10] sm:$0xff]  ;;  %v407_v15 = vld [vmem:[#allocation9 + $0x18] sm:$0xff] }
 0x138   :  { %226 = vrot.lane.b32.xlu1 %v224_v14, %s938_s11  ;;  %v799_v14 = vpack.c.bf16 %v405_v11, %v404_v10 }
 0x13c   :  { %215 = vrot.lane.b32.xlu1 %v213_v16, %s938_s11  ;;  %v802_v16 = vpack.c.bf16 %v407_v15, %v406_v12 }
 0x1aa   :  { %v227_v28 = vpop.permute.xlu1 %226 }
 0x1ab   :  { %v229_v29 = vadd.f32 %v227_v28, %v222_v25 }
 0x1ad   :  { %v231_v30 = vadd.f32 %v230_v27, %v229_v29 }
 0x1ae   :  { %v216_v32 = vpop.permute.xlu1 %215 }
 0x1af   :  { %234 = vrot.lane.b32.xlu0 %v231_v30, %s939_s13  ;;  %v218_v36 = vadd.f32 %v216_v32, %v211_v33 }
 0x1b1   :  { %v220_v39 = vadd.f32 %v219_v37, %v218_v36 }
 0x1b3   :  { %155 = vrot.lane.b32.xlu0 %v111_v13, %s938_s11  ;;  %v232_v40 = vadd.f32 %v220_v39, %v106_v23 }
 0x221   :  { %v235_v34 = vpop.permute.xlu0 %234 }
 0x222   :  { %v237_v35 = vadd.f32 %v235_v34, %v111_v13 }
 0x224   :  { %281 = vrot.lane.b32.xlu1 %v237_v35, %s938_s11 }
 0x225   :  { %v156_v38 = vpop.permute.xlu0 %155 }
 0x226   :  { %158 = vxpose.xlu0.b32.start.end [1/1] (short) (narrow) %v156_v38, 8 }
 0x228   :  { %191 = vperm.xlu1 %824, %v111_v13   ;;  %v944_v13 = vmov 0.0|0.0  }
 0x22c   :  { %825 = vset.pattern.permute.xlu1 %v941_v41 }
 0x22d   :  { %272 = vperm.xlu1 %825, %v232_v40  }
 0x24f   :  { %826 = vset.pattern.permute.xlu0 %v941_v41 }
 0x250   :  { %146 = vperm.xlu0 %826, %v106_v23  }
 0x254   :  { %827 = vset.pattern.permute.xlu0 %v940_v26 }
 0x255   :  { %317 = vperm.xlu0 %827, %v237_v35  }
 0x256   :  { %112 = vxpose.xlu1.b32.start.end [1/1] (short) (narrow) %v106_v23, 8 }
 0x273   :  { %238 = vxpose.xlu0.b32.start.end [1/1] (short) (narrow) %v232_v40, 8 }
 0x296   :  { %v282_v43 = vpop.permute.xlu1 %281 }
 0x297   :  { %284 = vxpose.xlu1.b32.start.end [1/1] (short) (narrow) %v282_v43, 8 }
 0x2a6   :  { %v174_v49 = vpop.trf.xlu0 }
 0x2a7   :  { %v192_v47 = vpop.permute.xlu1 %191  ;;  %v197_v51 = vrot.slane %v174_v49, %v151_v48 }
 0x2a9   :  { %v198_v53 = vsub.f32 %v192_v47, %v197_v51 }
 0x2ab   :  { %v200_v57 = vmul.f32 %v198_v53, %v198_v53 }
 0x2ac   :  { %v273_v50 = vpop.permute.xlu1 %272 }
 0x2cf   :  { %v147_v55 = vpop.permute.xlu0 %146 }
 0x2d4   :  { %v318_v62 = vpop.permute.xlu0 %317 }
 0x2d6   :  { %v128_v52 = vpop.trf.xlu1 }
 0x2d7   :  { %v152_v54 = vrot.slane %v128_v52, %v151_v48 }
 0x2d9   :  { %v153_v56 = vsub.f32 %v147_v55, %v152_v54 }
 0x2db   :  { %v199_v58 = vmul.f32 %v153_v56, %v153_v56 }
 0x2dd   :  { %v201_v59 = vadd.f32 %v200_v57, %v199_v58 }
 0x2df   :  { %v202_v60 = vadd.f32 1.0, %v201_v59 }
 0x2e1   :  { %828 = vrcp.f32 %v202_v60 }
 0x2eb   :  { %v829_v61 = vpop.eup %828 }
 0x2ec   :  { %762 = vmatpush3.msra.mxu0 %v829_v61 }
 0x2ed   :  { %798 = vmatprep.subr.bf16.mxu0 %v944_v13 }
 0x2f3   :  { %v254_v63 = vpop.trf.xlu0 }
 0x2f4   :  { %v278_v0 = vrot.slane %v254_v63, %v151_v48 }
 0x2f6   :  { %v279_v2 = vsub.f32 %v273_v50, %v278_v0 }
 0x2f8   :  { %v325_v5 = vmul.f32 %v279_v2, %v279_v2 }
 0x317   :  { %v300_v1 = vpop.trf.xlu1 }
 0x318   :  { %v323_v3 = vrot.slane %v300_v1, %v151_v48 }
 0x31a   :  { %v324_v4 = vsub.f32 %v318_v62, %v323_v3 }
 0x31c   :  { %v326_v6 = vmul.f32 %v324_v4, %v324_v4 }
 0x31e   :  { %v327_v7 = vadd.f32 %v326_v6, %v325_v5 }
 0x320   :  { %v328_v8 = vadd.f32 1.0, %v327_v7 }
 0x322   :  { %830 = vrcp.f32 %v328_v8 }
 0x32c   :  { %v831_v9 = vpop.eup %830 }
 0x32d   :  { %764 = vmatmul.mubr.msk.f32.vlgmr.msra.gmra.mrb[0].mxu0 %vm330_vm1, %v831_v9 }
 0x32e   :  { %779 = vmatprep.mubr.msk.f32.mxu0 %vm943_vm0, %v942_v42  ;;  %800 = vmatpush3.bf16.msra.mxu0 %v799_v14 }
 0x32f   :  { %801 = vmatprep.subr.bf16.mxu0 %v944_v13 }
 0x332   :  { %803 = vmatpush3.bf16.msra.mxu0 %v802_v16 }
 0x400   :  { %v400_v18 = vpop.f32.mrb[0].mxu0 }
 0x401   :  { %v765_v19 = vpop.f32.mrb[1].mxu0  ;;  %769 = vmatmul.mubr.msk.f32.vlgmr.msra.gmra.mrb[0].mxu1 %vm330_vm1, %v400_v18 }
 0x402   :  { %783 = vmatpush3.msra.mxu1 %v564_v17  ;;  %784 = vmatprep.mubr.msk.f32.mxu1 %vm943_vm0, %v942_v42 }
 0x403   :  { %804 = vmatprep.subr.bf16.mxu1 %v944_v13 }
 0x405   :  { %785 = vmatmul.mubr.msk.f32.vlgmr.msra.gmra.mrb[2].mxu1 %vm330_vm1, %v400_v18 }
 0x406   :  { %806 = vmatpush3.bf16.msra.mxu1 %v799_v14  ;;  %795 = vmatprep.mubr.msk.f32.mxu1 %vm943_vm0, %v942_v42 }
 0x407   :  { %807 = vmatprep.subr.bf16.mxu1 %v944_v13 }
 0x40a   :  { %809 = vmatpush3.bf16.msra.mxu1 %v802_v16 }
 0x4d4   :  { %v479_v20 = vpop.f32.mrb[0].mxu1 }
 0x4d5   :  { %v770_v21 = vpop.f32.mrb[1].mxu1  ;;  %780 = vmatmul.mubr.msk.f32.vlgmr.msra.gmra.mrb[2].mxu0 %vm489_vm2, %v479_v20 }
 0x4d8   :  { %v631_v22 = vpop.f32.mrb[2].mxu1 }
 0x4d9   :  { %v786_v23 = vpop.f32.mrb[3].mxu1  ;;  %796 = vmatmul.mubr.msk.f32.vlgmr.msra.gmra.mrb[4].mxu1 %vm489_vm2, %v631_v22 }
 0x5a8   :  { %v559_v25 = vpop.f32.mrb[2].mxu0 }
 0x5a9   :  { %v560_v26 = vadd.f32 %v741_v24, %v559_v25  ;;  %v781_v27 = vpop.f32.mrb[3].mxu0 }
 0x5ab   :  { %563 = vst [vmem:[#allocation11] sm:$0xff] %v560_v26 }
 0x5ac   :  { %v704_v28 = vpop.f32.mrb[4].mxu1 }
 0x5ad   :  { %v705_v29 = vadd.f32 %v741_v24, %v704_v28  ;;  %v797_v30 = vpop.f32.mrb[5].mxu1 }
 0x5af   :  { %708 = vst [vmem:[#allocation11 + $0x8] sm:$0xff] %v705_v29 }
 0x5b0   :  { %911 = shalt.err (!%p908_p2)
}
 0x5b1   :  { %s912_s3 = scalar_lea.hbm %s1068_s6, 256 }
 0x5b2   :  { %p913_p3 = scmp.ne.s32.totalorder %s1068_s6, %s912_s3  ;;  %p916_p4 = scmp.lt.u32.totalorder %s912_s3, %s1068_s6 }
 0x5b4   :  { %p918_p5 = pnand %p916_p4, %p913_p3 }
 0x5b6   :  { %921 = shalt.err (!%p918_p5)
}
 0x5b7   :  { %720 = dma.vmem_to_hbm [thread:$0]  %s715_s23, 256, %s1068_s6, [#allocation4], %s933_s2, %s933_s2, %s934_s10  }
 0x5b8   :  { %930 = dma.done.wait [#allocation4], 256  }
 0x5b9   :  { %931 = vsyncadd [#allocation4], 4294967040 }
 0x5ba   :  { %724 = vsyncpa [#allocation3], 1 }
 0x5bb   :  { %725 = vsyncpa [#allocation10], 1 }
 0x5bc   :  { %726 = vsyncpa [#allocation4], 1 }
 0x5bd   :  { %727 = vsyncpa [#allocation5], 1 }
 0x5be   :  { %728 = vsyncpa [#allocation8], 1 }

</bundles_post_ra>
